<compile_context>
chip_gen: v7x
topology: tpu7x:2x2x1
jax: 0.10.0
libtpu: 0.0.40
codegen_flags: <defaults>
</compile_context>

<pallas_src>
import jax
import jax.numpy as jnp
from jax import lax
from jax.experimental import pallas as pl
from jax.experimental.pallas import tpu as pltpu


def _round_up(x: int, m: int) -> int:
    return ((x + m - 1) // m) * m


def _pick_tile(dim: int, mult: int, cap: int) -> int:
    """Tile that is a multiple of `mult`, <= cap, and minimizes padding of `dim`."""
    d = _round_up(dim, mult)
    if d <= cap:
        return d
    nsteps = -(-d // cap)
    return _round_up(-(-d // nsteps), mult)


def _mix32(h):
    # "lowbias32" integer hash: a few VPU ops per vreg, works on TPU and in
    # interpret mode (no TPU-only PRNG primitives).
    h = h ^ (h >> 16)
    h = h * jnp.uint32(0x7FEB352D)
    h = h ^ (h >> 15)
    h = h * jnp.uint32(0x846CA68B)
    h = h ^ (h >> 16)
    return h


def _dropout_scale(shape, row0, col0, stride, seed_u32, threshold, scale):
    """Per-element multiplier: 0 (dropped) or 1/(1-p) (kept).

    Mask is keyed on the global (row, col) index with the unpadded output
    width as stride, so it is invariant to tiling/padding.  Note: wraps for
    M*d_out >= 2^32 (acceptable for a non-cryptographic dropout mask).
    """
    rows = lax.broadcasted_iota(jnp.int32, shape, 0).astype(jnp.uint32) + row0
    cols = lax.broadcasted_iota(jnp.int32, shape, 1).astype(jnp.uint32) + col0
    idx = rows * jnp.uint32(stride) + cols
    bits = _mix32(idx ^ seed_u32)
    keep = bits >= jnp.uint32(threshold)      # drop with prob ~p
    return jnp.where(keep, jnp.float32(scale), jnp.float32(0.0))


def _make_single_k_kernel(*, p, scale, threshold, stride, apply_bias, tm, tn):
    """Fast path: whole K reduction fits in one tile -> no accumulator scratch."""

    def kernel(seed_ref, x_ref, w_ref, *rest):
        if apply_bias:
            b_ref, o_ref = rest
        else:
            (o_ref,) = rest

        # Pallas-specific primitives only at the top level of the kernel body.
        if p > 0.0:
            row0 = (pl.program_id(0) * tm).astype(jnp.uint32)
            col0 = (pl.program_id(1) * tn).astype(jnp.uint32)

        # x tile (tm, tk) contracted with weight tile (tn, tk) on the MXU
        # (transposed-RHS form; weight stays in its native PyTorch layout).
        y = lax.dot_general(
            x_ref[...], w_ref[...],
            dimension_numbers=(((1,), (1,)), ((), ())),
            preferred_element_type=jnp.float32,
        )
        if apply_bias:
            y = y + b_ref[...].astype(jnp.float32)     # (1, tn) broadcasts
        if p > 0.0:
            seed_u32 = seed_ref[0].astype(jnp.uint32) * jnp.uint32(0x9E3779B9)
            y = y * _dropout_scale(y.shape, row0, col0, stride,
                                   seed_u32, threshold, scale)
        o_ref[...] = y.astype(o_ref.dtype)

    return kernel


def _make_multi_k_kernel(*, p, scale, threshold, stride, apply_bias, tm, tn):
    """General path: k-innermost grid with an f32 VMEM accumulator (P3)."""

    def kernel(seed_ref, x_ref, w_ref, *rest):
        if apply_bias:
            b_ref, o_ref, acc_ref = rest
        else:
            o_ref, acc_ref = rest

        # Hoist every pallas primitive out of the pl.when bodies (CPU/interpret
        # fallback cannot lower program_id inside a cond branch).
        k = pl.program_id(2)
        last_k = pl.num_programs(2) - 1
        if p > 0.0:
            row0 = (pl.program_id(0) * tm).astype(jnp.uint32)
            col0 = (pl.program_id(1) * tn).astype(jnp.uint32)

        @pl.when(k == 0)
        def _():
            if apply_bias:
                # Fold the bias into the accumulator init (saves one (tm,tn)
                # VPU add in the epilogue).
                acc_ref[...] = jnp.broadcast_to(
                    b_ref[...].astype(jnp.float32), acc_ref.shape)
            else:
                acc_ref[...] = jnp.zeros_like(acc_ref)

        acc_ref[...] += lax.dot_general(
            x_ref[...], w_ref[...],
            dimension_numbers=(((1,), (1,)), ((), ())),
            preferred_element_type=jnp.float32,
        )

        @pl.when(k == last_k)
        def _():
            y = acc_ref[...]
            if p > 0.0:
                seed_u32 = seed_ref[0].astype(jnp.uint32) * jnp.uint32(0x9E3779B9)
                y = y * _dropout_scale(y.shape, row0, col0, stride,
                                       seed_u32, threshold, scale)
            o_ref[...] = y.astype(o_ref.dtype)

    return kernel


def linear_dropout(x, weight, bias=None, *, p, seed=0, training=True):
    """Forward of the PyTorch module: Dropout(p)(x @ W^T + b).

    x: (..., d_in); weight: (d_out, d_in) (PyTorch layout); bias: (d_out,) or None.
    """
    orig_shape = x.shape
    d_in = orig_shape[-1]
    x2 = x.reshape(-1, d_in)
    M = x2.shape[0]
    d_out, d_in_w = weight.shape
    assert d_in_w == d_in, "weight/in-feature mismatch"

    p_eff = float(p) if training else 0.0
    assert 0.0 <= p_eff < 1.0, "dropout prob must be in [0, 1)"
    apply_bias = bias is not None

    # Tile selection: lane-dense (tn/tk multiples of 128), sublane-packed rows
    # (tm multiple of 8 for f32, 16 for bf16, 32 for 1-byte dtypes).  Caps
    # (512, 512, 1024) give ~11 MiB double-buffered f32 working set -> fits
    # every generation (v7x has only 64 MiB VMEM per TC).
    itemsize = jnp.dtype(x.dtype).itemsize
    sub_mult = max(8, 32 // itemsize)
    tm = _pick_tile(M, sub_mult, 512)
    tn = _pick_tile(d_out, 128, 512)
    tk = _pick_tile(d_in, 128, 1024)

    Mp, Np, Kp = _round_up(M, tm), _round_up(d_out, tn), _round_up(d_in, tk)

    xp = x2 if (Mp == M and Kp == d_in) else jnp.pad(
        x2, ((0, Mp - M), (0, Kp - d_in)))
    wp = weight if (Np == d_out and Kp == d_in) else jnp.pad(
        weight, ((0, Np - d_out), (0, Kp - d_in)))
    seed_arr = jnp.asarray([seed], dtype=jnp.int32)

    threshold = min(int(round(p_eff * (1 << 32))), (1 << 32) - 1)
    scale = 1.0 / (1.0 - p_eff) if p_eff > 0.0 else 1.0

    nk = Kp // tk
    flops = 2 * M * d_out * d_in
    bytes_accessed = (x2.size + weight.size + M * d_out
                      + (d_out if apply_bias else 0)) * itemsize
    cost = pl.CostEstimate(flops=flops, transcendentals=0,
                           bytes_accessed=bytes_accessed)

    kernel_kwargs = dict(p=p_eff, scale=scale, threshold=threshold,
                         stride=d_out, apply_bias=apply_bias, tm=tm, tn=tn)

    operands = [seed_arr, xp, wp]
    if apply_bias:
        bp = bias if Np == d_out else jnp.pad(bias, (0, Np - d_out))
        operands.append(bp.reshape(1, Np))

    if nk == 1:
        # Single-K fast path: 2D grid, no accumulator scratch.
        grid = (Mp // tm, Np // tn)
        in_specs = [
            pl.BlockSpec(memory_space=pltpu.SMEM),           # seed scalar
            pl.BlockSpec((tm, tk), lambda i, j: (i, 0)),     # x tile
            pl.BlockSpec((tn, tk), lambda i, j: (j, 0)),     # W tile (native layout)
        ]
        if apply_bias:
            in_specs.append(pl.BlockSpec((1, tn), lambda i, j: (0, j)))
        out_spec = pl.BlockSpec((tm, tn), lambda i, j: (i, j))
        kernel = _make_single_k_kernel(**kernel_kwargs)
        scratch = []
        dims = ("parallel", "parallel")
    else:
        grid = (Mp // tm, Np // tn, nk)
        in_specs = [
            pl.BlockSpec(memory_space=pltpu.SMEM),
            pl.BlockSpec((tm, tk), lambda i, j, k: (i, k)),
            pl.BlockSpec((tn, tk), lambda i, j, k: (j, k)),
        ]
        if apply_bias:
            in_specs.append(pl.BlockSpec((1, tn), lambda i, j, k: (0, j)))
        out_spec = pl.BlockSpec((tm, tn), lambda i, j, k: (i, j))
        kernel = _make_multi_k_kernel(**kernel_kwargs)
        scratch = [pltpu.VMEM((tm, tn), jnp.float32)]
        dims = ("parallel", "parallel", "arbitrary")

    out_padded = pl.pallas_call(
        kernel,
        out_shape=jax.ShapeDtypeStruct((Mp, Np), x.dtype),
        grid_spec=pl.GridSpec(
            grid=grid,
            in_specs=in_specs,
            out_specs=out_spec,
            scratch_shapes=scratch,
        ),
        compiler_params=pltpu.CompilerParams(
            dimension_semantics=dims,
            vmem_limit_bytes=48 * 1024 * 1024,
        ),
        cost_estimate=cost,
    )(*operands)

    out = out_padded[:M, :d_out]
    return out.reshape(*orig_shape[:-1], d_out)


if __name__ == "__main__":
    key = jax.random.PRNGKey(0)
    k_x, k_w, k_b, k_x2, k_w2, k_b2 = jax.random.split(key, 6)

    # ---- Small case (single-K fast path) ----
    batch, d_in, d_out = 8, 32, 16
    dropout_p = 0.25

    x = jax.random.normal(k_x, (batch, d_in), dtype=jnp.float32)
    # Deterministic param init mirroring the PyTorch module:
    #   xavier_normal_ on weight; default nn.Linear bias init U(-1/sqrt(d_in), 1/sqrt(d_in)).
    xavier_std = (2.0 / (d_in + d_out)) ** 0.5
    weight = xavier_std * jax.random.normal(k_w, (d_out, d_in), dtype=jnp.float32)
    bound = 1.0 / (d_in ** 0.5)
    bias = jax.random.uniform(k_b, (d_out,), minval=-bound, maxval=bound,
                              dtype=jnp.float32)

    ref = jnp.dot(x, weight.T, precision=jax.lax.Precision.HIGHEST) + bias

    # Training mode: every element must be 0 (dropped) or ref/(1-p) (kept).
    out = jax.block_until_ready(
        linear_dropout(x, weight, bias, p=dropout_p, seed=42, training=True))
    assert out.shape == (batch, d_out)
    scale = 1.0 / (1.0 - dropout_p)
    dropped = jnp.isclose(out, 0.0, atol=1e-6)
    kept_ok = jnp.isclose(out, ref * scale, atol=2e-3, rtol=2e-3)
    assert bool(jnp.all(dropped | kept_ok)), "training-mode values not in {0, ref/(1-p)}"
    n_drop = int(jnp.sum(dropped))
    assert 0 < n_drop < out.size, "dropout mask degenerate"

    # Eval mode: dropout off, must match the plain linear layer.
    out_eval = jax.block_until_ready(
        linear_dropout(x, weight, bias, p=dropout_p, training=False))
    assert jnp.allclose(out_eval, ref, atol=2e-3, rtol=2e-3), "eval-mode mismatch"

    # bias=False path of the module.
    out_nb = jax.block_until_ready(
        linear_dropout(x, weight, None, p=dropout_p, training=False))
    ref_nb = jnp.dot(x, weight.T, precision=jax.lax.Precision.HIGHEST)
    assert jnp.allclose(out_nb, ref_nb, atol=2e-3, rtol=2e-3), "no-bias mismatch"

    # ---- Larger d_in exercising the multi-K accumulator path ----
    d_in2, d_out2 = 1536, 16
    x2 = jax.random.normal(k_x2, (batch, d_in2), dtype=jnp.float32)
    w2 = ((2.0 / (d_in2 + d_out2)) ** 0.5) * jax.random.normal(
        k_w2, (d_out2, d_in2), dtype=jnp.float32)
    b2 = jax.random.uniform(k_b2, (d_out2,), minval=-1.0 / (d_in2 ** 0.5),
                            maxval=1.0 / (d_in2 ** 0.5), dtype=jnp.float32)
    ref2 = jnp.dot(x2, w2.T, precision=jax.lax.Precision.HIGHEST) + b2
    out2 = jax.block_until_ready(
        linear_dropout(x2, w2, b2, p=dropout_p, training=False))
    assert jnp.allclose(out2, ref2, atol=5e-3, rtol=5e-3), "multi-K mismatch"

    print("KERNEL_OK")
</pallas_src>

<mosaic_0001>
module attributes {stable_mosaic.version = 11 : i64} {
  func.func @kernel(%arg0: i32, %arg1: i32, %arg2: memref<1xi32, #tpu.memory_space<smem>>, %arg3: memref<8x128xf32, #tpu.memory_space<vmem>>, %arg4: memref<128x128xf32, #tpu.memory_space<vmem>>, %arg5: memref<1x128xf32, #tpu.memory_space<vmem>>, %arg6: memref<8x128xf32, #tpu.memory_space<vmem>>) attributes {dimension_semantics = [#tpu.dimension_semantics<parallel>, #tpu.dimension_semantics<parallel>], iteration_bounds = array<i64: 1, 1>, scalar_prefetch = 0 : i64, scratch_operands = 0 : i64, tpu.core_type = #tpu.core_type<tc>, window_params = [{transform_indices = @transform_0, window_bounds = array<i64: 1>}, {transform_indices = @transform_1, window_bounds = array<i64: 8, 128>}, {transform_indices = @transform_2, window_bounds = array<i64: 128, 128>}, {transform_indices = @transform_3, window_bounds = array<i64: 1, 128>}, {transform_indices = @transform_4, window_bounds = array<i64: 8, 128>}]} {
    %c8_i32 = arith.constant 8 : i32
    %0 = arith.muli %arg0, %c8_i32 : i32
    %c128_i32 = arith.constant 128 : i32
    %1 = arith.muli %arg1, %c128_i32 : i32
    %c0 = arith.constant 0 : index
    %c0_0 = arith.constant 0 : index
    %2 = vector.load %arg3[%c0, %c0_0] : memref<8x128xf32, #tpu.memory_space<vmem>>, vector<8x128xf32>
    %c0_1 = arith.constant 0 : index
    %c0_2 = arith.constant 0 : index
    %3 = vector.load %arg4[%c0_1, %c0_2] : memref<128x128xf32, #tpu.memory_space<vmem>>, vector<128x128xf32>
    %cst = arith.constant dense<0.000000e+00> : vector<8x128xf32>
    %4 = tpu.matmul %2, %3, %cst {dimension_numbers = #tpu.dot_dimension_numbers<[1], [1], [0], [0], [0, 0, 1, 0], [], []>} : vector<8x128xf32>, vector<128x128xf32>, vector<8x128xf32> -> vector<8x128xf32>
    %c0_3 = arith.constant 0 : index
    %c0_4 = arith.constant 0 : index
    %5 = vector.load %arg5[%c0_3, %c0_4] : memref<1x128xf32, #tpu.memory_space<vmem>>, vector<1x128xf32>
    %6 = vector.broadcast %5 : vector<1x128xf32> to vector<8x128xf32>
    %7 = arith.addf %4, %6 : vector<8x128xf32>
    %c0_5 = arith.constant 0 : index
    %8 = memref.load %arg2[%c0_5] : memref<1xi32, #tpu.memory_space<smem>>
    %c-1640531527_i32 = arith.constant -1640531527 : i32
    %9 = arith.muli %8, %c-1640531527_i32 : i32
    %10 = tpu.iota {dimensions = array<i32: 0>} : vector<8x128xi32>
    %11 = vector.broadcast %0 : i32 to vector<8x128xi32>
    %12 = arith.addi %10, %11 : vector<8x128xi32>
    %13 = tpu.iota {dimensions = array<i32: 1>} : vector<8x128xi32>
    %14 = vector.broadcast %1 : i32 to vector<8x128xi32>
    %15 = arith.addi %13, %14 : vector<8x128xi32>
    %c16_i32 = arith.constant 16 : i32
    %16 = vector.broadcast %c16_i32 : i32 to vector<8x128xi32>
    %17 = arith.muli %12, %16 : vector<8x128xi32>
    %18 = arith.addi %17, %15 : vector<8x128xi32>
    %19 = vector.broadcast %9 : i32 to vector<8x128xi32>
    %20 = arith.xori %18, %19 : vector<8x128xi32>
    %c16_i32_6 = arith.constant 16 : i32
    %21 = vector.broadcast %c16_i32_6 : i32 to vector<8x128xi32>
    %22 = arith.shrui %20, %21 : vector<8x128xi32>
    %23 = arith.xori %20, %22 : vector<8x128xi32>
    %c2146121005_i32 = arith.constant 2146121005 : i32
    %24 = vector.broadcast %c2146121005_i32 : i32 to vector<8x128xi32>
    %25 = arith.muli %23, %24 : vector<8x128xi32>
    %c15_i32 = arith.constant 15 : i32
    %26 = vector.broadcast %c15_i32 : i32 to vector<8x128xi32>
    %27 = arith.shrui %25, %26 : vector<8x128xi32>
    %28 = arith.xori %25, %27 : vector<8x128xi32>
    %c-2073254261_i32 = arith.constant -2073254261 : i32
    %29 = vector.broadcast %c-2073254261_i32 : i32 to vector<8x128xi32>
    %30 = arith.muli %28, %29 : vector<8x128xi32>
    %c16_i32_7 = arith.constant 16 : i32
    %31 = vector.broadcast %c16_i32_7 : i32 to vector<8x128xi32>
    %32 = arith.shrui %30, %31 : vector<8x128xi32>
    %33 = arith.xori %30, %32 : vector<8x128xi32>
    %c1073741824_i32 = arith.constant 1073741824 : i32
    %34 = vector.broadcast %c1073741824_i32 : i32 to vector<8x128xi32>
    %35 = arith.cmpi uge, %33, %34 : vector<8x128xi32>
    %cst_8 = arith.constant 1.33333337 : f32
    %cst_9 = arith.constant 0.000000e+00 : f32
    %36 = vector.broadcast %cst_8 : f32 to vector<8x128xf32>
    %37 = vector.broadcast %cst_9 : f32 to vector<8x128xf32>
    %38 = arith.select %35, %36, %37 : vector<8x128xi1>, vector<8x128xf32>
    %39 = arith.mulf %7, %38 : vector<8x128xf32>
    %c0_10 = arith.constant 0 : index
    %c0_11 = arith.constant 0 : index
    %40 = vector.load %arg6[%c0_10, %c0_11] : memref<8x128xf32, #tpu.memory_space<vmem>>, vector<8x128xf32>
    tpu.vector_store %arg6[%c0_10, %c0_11], %39 {strides = array<i32>} : memref<8x128xf32, #tpu.memory_space<vmem>>, vector<8x128xf32>,
    return
  }
  func.func @transform_0(%arg0: i32, %arg1: i32) -> i32 {
    %c0_i32 = arith.constant 0 : i32
    %c0_i32_0 = arith.constant 0 : i32
    return %c0_i32 : i32
  }
  func.func @transform_1(%arg0: i32, %arg1: i32) -> (i32, i32) {
    %c0_i32 = arith.constant 0 : i32
    %c0_i32_0 = arith.constant 0 : i32
    return %arg0, %c0_i32 : i32, i32
  }
  func.func @transform_2(%arg0: i32, %arg1: i32) -> (i32, i32) {
    %c0_i32 = arith.constant 0 : i32
    %c0_i32_0 = arith.constant 0 : i32
    return %arg1, %c0_i32 : i32, i32
  }
  func.func @transform_3(%arg0: i32, %arg1: i32) -> (i32, i32) {
    %c0_i32 = arith.constant 0 : i32
    %c0_i32_0 = arith.constant 0 : i32
    return %c0_i32, %arg1 : i32, i32
  }
  func.func @transform_4(%arg0: i32, %arg1: i32) -> (i32, i32) {
    %c0_i32 = arith.constant 0 : i32
    return %arg0, %arg1 : i32, i32
  }
}

</mosaic_0001>

<bundles_post_ra>
// kernel: tpu_custom_call.1
= control target key start
LH: loop header
LB: loop body
LE: loop exit
PB: predicated region body
PF: predicated region fallthrough
CT: control target
= control target key end

     0   :  { %10 = vsyncpa [#allocation4], 0  ;;  %s422_s0 = inlined_call_operand.<no memory space> [shape: s32[1], index: 0, kind: input, shape index: {}]   ;;  %s423_s1 = inlined_call_operand.hbm [shape: f32[8,128], index: 1, kind: input, shape index: {}]   ;;  %s424_s2 = inlined_call_operand.hbm [shape: f32[128,128], index: 2, kind: input, shape index: {}]   ;;  %s425_s3 = inlined_call_operand.vmem [shape: f32[1,128], index: 3, kind: input, shape index: {}]   ;;  %s426_s4 = inlined_call_operand.hbm [shape: f32[8,128], index: 4, kind: output, shape index: {}]  }
   0x1   :  { %11 = vsyncpa [#allocation7], 0 }
   0x2   :  { %12 = vsyncpa [#allocation5], 0  ;;  %s340_s15 = smov [#allocation3]   ;;  %s341_s17 = smov [#allocation6]  }
   0x3   :  { %s21_s16 = sshll.u32 %s340_s15, 4  ;;  %s30_s18 = sshll.u32 %s341_s17, 4  ;;  %s22_s16 = int_to_ptr.vmem [resolvable:$true] %s21_s16  ;;  %s373_s18 = int_to_ptr.vmem [resolvable:$true] %s30_s18 }
   0x4   :  { %s268_s21 = scalar_lea.hbm %s423_s1, 128 }
   0x5   :  { %p269_p0 = scmp.ne.s32.totalorder %s423_s1, %s268_s21  ;;  %p272_p1 = scmp.lt.u32.totalorder %s268_s21, %s423_s1 }
   0x7   :  { %p274_p2 = pnand %p272_p1, %p269_p0 }
   0x9   :  { %277 = shalt.err (!%p274_p2)
}
   0xa   :  { %s278_s26 = scalar_lea.vmem %s22_s16, 128  ;;  %p283_p4 = scmp.lt.s32.totalorder %s22_s16, %s22_s16 }
   0xb   :  { %p279_p3 = scmp.ne.s32.totalorder %s22_s16, %s278_s26  ;;  %p284_p5 = scmp.lt.s32.totalorder %s278_s26, %s278_s26 }
   0xd   :  { %p285_p6 = por %p284_p5, %p283_p4 }
   0xf   :  { %p286_p7 = pnand %p285_p6, %p279_p3 }
  0x11   :  { %289 = shalt.err (!%p286_p7)
}
  0x12   :  { %24 = dma.hbm_to_vmem [thread:$0]  %s423_s1, 128, %s22_s16, [#allocation4]  }
  0x13   :  { %s290_s5 = scalar_lea.hbm %s424_s2, 2048 }
  0x14   :  { %p291_p8 = scmp.ne.s32.totalorder %s424_s2, %s290_s5  ;;  %p294_p9 = scmp.lt.u32.totalorder %s290_s5, %s424_s2 }
  0x16   :  { %p296_p10 = pnand %p294_p9, %p291_p8 }
  0x18   :  { %299 = shalt.err (!%p296_p10)
}
  0x19   :  { %s300_s10 = scalar_lea.vmem %s373_s18, 2048  ;;  %p305_p12 = scmp.lt.s32.totalorder %s373_s18, %s373_s18 }
  0x1a   :  { %p301_p11 = scmp.ne.s32.totalorder %s373_s18, %s300_s10  ;;  %p306_p13 = scmp.lt.s32.totalorder %s300_s10, %s300_s10 }
  0x1c   :  { %p307_p0 = por %p306_p13, %p305_p12 }
  0x1e   :  { %p308_p1 = pnand %p307_p0, %p301_p11 }
  0x20   :  { %311 = shalt.err (!%p308_p1)
}
  0x21   :  { %s342_s1 = smov 128   ;;  %s343_s11 = smov 8  }
  0x22   :  { %36 = dma.hbm_to_vmem [thread:$0]  %s424_s2, 2048, %s373_s18, [#allocation7], %s342_s1, %s342_s1, %s343_s11  }
  0x23   :  { %334 = dma.done.wait [#allocation4], 128  }
  0x24   :  { %335 = vsyncadd [#allocation4], 4294967168 }
  0x25   :  { %336 = dma.done.wait [#allocation7], 2048  }
  0x26   :  { %337 = vsyncadd [#allocation7], 4294965248  ;;  %v344_v0 = vmov 0.0|0.0   ;;  %vm345_vm0 = vmmov 0   ;;  %v346_v1 = vmov 0.0   ;;  %v48_v2 = vld [vmem:[#allocation6] sm:$0xff]  ;;  %v143_v27 = vlaneseq }
  0x27   :  { %236 = vmatprep.subr.bf16.mxu0 %v344_v0  ;;  %233 = vmatprep.mubr.msk.f32.mxu0 %vm345_vm0, %v346_v1  ;;  %v49_v3 = vld [vmem:[#allocation6 + $0x8] sm:$0xff]  ;;  %v50_v5 = vld [vmem:[#allocation6 + $0x10] sm:$0xff]  ;;  %v51_v6 = vld [vmem:[#allocation6 + $0x18] sm:$0xff]  ;;  %s142_s15 = smul.u32 2654435769, %s422_s0  ;;  %s347_s18 = smov [#allocation8]  }
  0x28   :  { %v237_v4 = vpack.c.bf16 %v49_v3, %v48_v2  ;;  %v240_v7 = vpack.c.bf16 %v51_v6, %v50_v5  ;;  %v52_v8 = vld [vmem:[#allocation6 + $0x20] sm:$0xff]  ;;  %v53_v9 = vld [vmem:[#allocation6 + $0x28] sm:$0xff]  ;;  %v54_v11 = vld [vmem:[#allocation6 + $0x30] sm:$0xff]  ;;  %v144_v28 = vshrl.u32 %v143_v27, 7  ;;  %v148_v29 = vand.u32 127, %v143_v27  ;;  %s173_s0 = sshll.u32 %s347_s18, 4  ;;  %s174_s0 = int_to_ptr.vmem [resolvable:$true] %s173_s0 }
  0x29   :  { %v243_v10 = vpack.c.bf16 %v53_v9, %v52_v8  ;;  %v55_v12 = vld [vmem:[#allocation6 + $0x38] sm:$0xff]  ;;  %v56_v14 = vld [vmem:[#allocation6 + $0x40] sm:$0xff]  ;;  %v57_v15 = vld [vmem:[#allocation6 + $0x48] sm:$0xff]  ;;  %v153_v32 = vstv %s142_s15  ;;  %s312_s19 = scalar_lea.vmem %s174_s0, 128  ;;  %p317_p3 = scmp.lt.s32.totalorder %s174_s0, %s174_s0 }
  0x2a   :  { %238 = vmatpush3.bf16.xpose.msra.mxu0 %v237_v4  ;;  %v246_v13 = vpack.c.bf16 %v55_v12, %v54_v11  ;;  %v249_v16 = vpack.c.bf16 %v57_v15, %v56_v14  ;;  %v58_v17 = vld [vmem:[#allocation6 + $0x50] sm:$0xff]  ;;  %v59_v18 = vld [vmem:[#allocation6 + $0x58] sm:$0xff]  ;;  %v60_v20 = vld [vmem:[#allocation6 + $0x60] sm:$0xff]  ;;  %v151_v30 = vmul.u32 16, %v144_v28  ;;  %p313_p2 = scmp.ne.s32.totalorder %s174_s0, %s312_s19  ;;  %p318_p4 = scmp.lt.s32.totalorder %s312_s19, %s312_s19 }
  0x2b   :  { %239 = vmatprep.subr.bf16.mxu0 %v344_v0  ;;  %v252_v19 = vpack.c.bf16 %v59_v18, %v58_v17  ;;  %v61_v21 = vld [vmem:[#allocation6 + $0x68] sm:$0xff]  ;;  %v62_v23 = vld [vmem:[#allocation6 + $0x70] sm:$0xff]  ;;  %v63_v24 = vld [vmem:[#allocation6 + $0x78] sm:$0xff] }
  0x2c   :  { %v255_v22 = vpack.c.bf16 %v61_v21, %v60_v20  ;;  %v258_v25 = vpack.c.bf16 %v63_v24, %v62_v23  ;;  %v47_v26 = vld [vmem:[#allocation3] sm:$0xff]  ;;  %v152_v31 = vadd.s32 %v151_v30, %v148_v29  ;;  %p319_p5 = por %p318_p4, %p317_p3 }
  0x2d   :  { %v183_v42 = vld [vmem:[%s425_s3] ss:$0 sm:$0xff] }
  0x2e   :  { %v154_v33 = vxor.u32 %v153_v32, %v152_v31  ;;  %p320_p6 = pnand %p319_p5, %p313_p2 }
  0x30   :  { %v155_v34 = vshrl.u32 %v154_v33, 16 }
  0x32   :  { %241 = vmatpush3.bf16.xpose.msra.mxu0 %v240_v7  ;;  %v156_v35 = vxor.u32 %v155_v34, %v154_v33 }
  0x33   :  { %242 = vmatprep.subr.bf16.mxu0 %v344_v0 }
  0x34   :  { %v157_v36 = vmul.u32 2146121005, %v156_v35 }
  0x36   :  { %v158_v37 = vshrl.u32 %v157_v36, 15 }
  0x38   :  { %v159_v38 = vxor.u32 %v158_v37, %v157_v36 }
  0x3a   :  { %244 = vmatpush3.bf16.xpose.msra.mxu0 %v243_v10  ;;  %v160_v39 = vmul.u32 2221713035, %v159_v38 }
  0x3b   :  { %245 = vmatprep.subr.bf16.mxu0 %v344_v0 }
  0x3c   :  { %v161_v40 = vshrl.u32 %v160_v39, 16 }
  0x3e   :  { %v162_v41 = vxor.u32 %v161_v40, %v160_v39 }
  0x40   :  { %vm163_vm1 = vcmp.ge.u32.totalorder %v162_v41, 1073741824 }
  0x41   :  { %v164_v43 = vsel %vm163_vm1, 1.3333334, %v346_v1 }
  0x42   :  { %247 = vmatpush3.bf16.xpose.msra.mxu0 %v246_v13 }
  0x43   :  { %248 = vmatprep.subr.bf16.mxu0 %v344_v0 }
  0x4a   :  { %250 = vmatpush3.bf16.xpose.msra.mxu0 %v249_v16 }
  0x4b   :  { %251 = vmatprep.subr.bf16.mxu0 %v344_v0 }
  0x52   :  { %253 = vmatpush3.bf16.xpose.msra.mxu0 %v252_v19 }
  0x53   :  { %254 = vmatprep.subr.bf16.mxu0 %v344_v0 }
  0x5a   :  { %256 = vmatpush3.bf16.xpose.msra.mxu0 %v255_v22 }
  0x5b   :  { %257 = vmatprep.subr.bf16.mxu0 %v344_v0 }
  0x62   :  { %259 = vmatpush3.bf16.xpose.msra.mxu0 %v258_v25 }
  0x69   :  { %234 = vmatmul.mubr.f32.vlgmr.msra.gmra.mrb[0].mxu0 %v47_v26 }
 0x13c   :  { %v137_v44 = vpop.f32.mrb[0].mxu0 }
 0x13d   :  { %v138_v45 = vadd.f32 %v183_v42, %v137_v44  ;;  %v235_v46 = vpop.f32.mrb[1].mxu0 }
 0x13f   :  { %v165_v47 = vmul.f32 %v164_v43, %v138_v45 }
 0x141   :  { %166 = vst [vmem:[#allocation8] sm:$0xff] %v165_v47 }
 0x142   :  { %323 = shalt.err (!%p320_p6)
}
 0x143   :  { %s324_s3 = scalar_lea.hbm %s426_s4, 128 }
 0x144   :  { %p325_p7 = scmp.ne.s32.totalorder %s426_s4, %s324_s3  ;;  %p328_p8 = scmp.lt.u32.totalorder %s324_s3, %s426_s4 }
 0x146   :  { %p330_p9 = pnand %p328_p8, %p325_p7 }
 0x148   :  { %333 = shalt.err (!%p330_p9)
}
 0x149   :  { %176 = dma.vmem_to_hbm [thread:$0]  %s174_s0, 128, %s426_s4, [#allocation5]  }
 0x14a   :  { %338 = dma.done.wait [#allocation5], 128  }
 0x14b   :  { %339 = vsyncadd [#allocation5], 4294967168 }
 0x14c   :  { %180 = vsyncpa [#allocation4], 1 }
 0x14d   :  { %181 = vsyncpa [#allocation7], 1 }
 0x14e   :  { %182 = vsyncpa [#allocation5], 1 }

</bundles_post_ra>
